<compile_context>
chip_gen: v7x
topology: tpu7x:2x2x1
jax: 0.10.0
libtpu: 0.0.40
codegen_flags: <defaults>
</compile_context>

<pallas_src>
import functools

import jax
import jax.numpy as jnp
from jax.experimental import pallas as pl
from jax.experimental.pallas import tpu as pltpu


# ----------------------------------------------------------------------------
# Kernels
# ----------------------------------------------------------------------------
def _value_only_kernel(t_ref, wv_ref, bv_ref, o_ref):
    # attn == 1.0 exactly (softmax over a size-1 axis), so out == V.
    v = jnp.dot(t_ref[...], wv_ref[...], preferred_element_type=jnp.float32)
    o_ref[...] = (v + bv_ref[...]).astype(o_ref.dtype)


def _faithful_kernel(scale, v_ref, i_ref, t_ref,
                     wq_ref, bq_ref, wk_ref, bk_ref, wv_ref, bv_ref, o_ref):
    # Full reference math (validation / debug only; attn == 1 for all finite
    # scores, NaN if scores overflow -- matching torch.softmax).
    q = jnp.dot(v_ref[...], wq_ref[...], preferred_element_type=jnp.float32) + bq_ref[...]
    k = jnp.dot(i_ref[...], wk_ref[...], preferred_element_type=jnp.float32) + bk_ref[...]
    v = jnp.dot(t_ref[...], wv_ref[...], preferred_element_type=jnp.float32) + bv_ref[...]
    scores = jnp.sum(q * k, axis=-1, keepdims=True) * scale      # [TILE_B, 1]
    attn = jnp.exp(scores - scores)                              # == 1 (NaN on overflow)
    attn = attn / jnp.sum(attn, axis=-1, keepdims=True)
    o_ref[...] = (attn * v).astype(o_ref.dtype)


# ----------------------------------------------------------------------------
# Wrapper
# ----------------------------------------------------------------------------
def _round_up(x, m):
    return ((x + m - 1) // m) * m


def cross_attention_fusion(verb_feat, inst_feat, target_feat, params,
                           common_dim=128, *, faithful=False, tile_b=4096,
                           compute_dtype=None, out_dtype=jnp.float32,
                           impl="auto", min_pallas_batch=1024):
    """Forward pass of CrossAttentionFusion.

    Weights are stored pre-transposed as [d_in, common_dim]; biases as
    [1, common_dim].

    impl:
      "auto"   -> plain (XLA-fused) JAX for small B fast path, Pallas otherwise.
      "pallas" -> always use the Pallas kernel.
      "xla"    -> always use plain JAX (fast path math only).
    compute_dtype: optional narrower dtype (e.g. jnp.bfloat16) for activations
      and weight matrices fed to the MXU (f32 accumulation is kept).
    out_dtype: output dtype (bf16 halves the dominant output HBM traffic).
    """
    B = target_feat.shape[0]
    C = common_dim

    if impl == "auto":
        impl = "xla" if (B < min_pallas_batch and not faithful) else "pallas"

    if impl == "xla":
        # softmax over a size-1 key axis == 1.0 -> output is the value projection.
        out = target_feat @ params["wv"] + params["bv"]
        return out.astype(out_dtype)

    # ---------------- Pallas path ----------------
    def maybe_cast(x):
        return x.astype(compute_dtype) if compute_dtype is not None else x

    # Batch tile: multiple of 8 (or the full batch when B <= 8); capped so the
    # "parallel" batch axis has >= 2 grid steps for v7x's two TensorCores.
    if B <= 8:
        tb = B
    else:
        tb = min(tile_b, _round_up(B, 8))
        tb = min(tb, max(8, _round_up(pl.cdiv(B, 2), 8)))
    grid = (pl.cdiv(B, tb),)

    def row_spec(d):                    # batch-tiled activations / output
        return pl.BlockSpec((tb, d), lambda i: (i, 0))

    def resident(arr):                  # weights/biases: resident across grid steps
        return pl.BlockSpec(arr.shape, lambda i: (0, 0))

    out_shape = jax.ShapeDtypeStruct((B, C), out_dtype)
    cparams = pltpu.CompilerParams(dimension_semantics=("parallel",))

    if not faithful:
        return pl.pallas_call(
            _value_only_kernel,
            out_shape=out_shape,
            grid=grid,
            in_specs=[row_spec(target_feat.shape[1]),
                      resident(params["wv"]),
                      resident(params["bv"])],
            out_specs=row_spec(C),
            compiler_params=cparams,
        )(maybe_cast(target_feat), maybe_cast(params["wv"]), params["bv"])

    kernel = functools.partial(_faithful_kernel, 1.0 / (C ** 0.5))
    return pl.pallas_call(
        kernel,
        out_shape=out_shape,
        grid=grid,
        in_specs=[row_spec(verb_feat.shape[1]),
                  row_spec(inst_feat.shape[1]),
                  row_spec(target_feat.shape[1]),
                  resident(params["wq"]), resident(params["bq"]),
                  resident(params["wk"]), resident(params["bk"]),
                  resident(params["wv"]), resident(params["bv"])],
        out_specs=row_spec(C),
        compiler_params=cparams,
    )(maybe_cast(verb_feat), maybe_cast(inst_feat), maybe_cast(target_feat),
      maybe_cast(params["wq"]), params["bq"],
      maybe_cast(params["wk"]), params["bk"],
      maybe_cast(params["wv"]), params["bv"])


# ----------------------------------------------------------------------------
# Init / reference
# ----------------------------------------------------------------------------
def _init_params(key, feature_dims, common_dim):
    """Deterministic synthetic init (shapes match nn.Linear(d_in, common_dim))."""
    ks = jax.random.split(key, 6)

    def linear(kw, kb, d_in):
        # stored as [d_in, common_dim] == transpose of torch's [out, in]
        w = jax.random.normal(kw, (d_in, common_dim), jnp.float32) * 0.02
        b = jax.random.normal(kb, (1, common_dim), jnp.float32) * 0.02
        return w, b

    wq, bq = linear(ks[0], ks[1], feature_dims["verb"])
    wk, bk = linear(ks[2], ks[3], feature_dims["instrument"])
    wv, bv = linear(ks[4], ks[5], feature_dims["target"])
    return dict(wq=wq, bq=bq, wk=wk, bk=bk, wv=wv, bv=bv)


def _reference(verb, inst, target, p, common_dim):
    q = verb @ p["wq"] + p["bq"]
    k = inst @ p["wk"] + p["bk"]
    v = target @ p["wv"] + p["bv"]
    scores = jnp.sum(q * k, axis=-1, keepdims=True) / (common_dim ** 0.5)  # [B,1]
    attn = jax.nn.softmax(scores[:, None, :], axis=-1)                     # [B,1,1]
    return (attn @ v[:, None, :])[:, 0, :]


# ----------------------------------------------------------------------------
# Demo / validation
# ----------------------------------------------------------------------------
if __name__ == "__main__":
    feature_dims = {"verb": 32, "instrument": 48, "target": 64}
    common_dim = 128
    B = 2

    key = jax.random.PRNGKey(0)
    k_v, k_i, k_t, k_p = jax.random.split(key, 4)
    verb_feat = jax.random.normal(k_v, (B, feature_dims["verb"]), jnp.float32)
    inst_feat = jax.random.normal(k_i, (B, feature_dims["instrument"]), jnp.float32)
    target_feat = jax.random.normal(k_t, (B, feature_dims["target"]), jnp.float32)
    params = _init_params(k_p, feature_dims, common_dim)

    ref = _reference(verb_feat, inst_feat, target_feat, params, common_dim)

    # 1) Fast Pallas kernel (forced), f32 -- mathematically identical output.
    out_pl = jax.block_until_ready(
        cross_attention_fusion(verb_feat, inst_feat, target_feat, params,
                               common_dim, impl="pallas"))
    assert out_pl.shape == (B, common_dim)
    assert jnp.allclose(out_pl, ref, atol=1e-5, rtol=1e-5)

    # 2) Auto path at tiny B -> plain fused XLA projection (perf-review rec #1).
    out_auto = jax.block_until_ready(
        cross_attention_fusion(verb_feat, inst_feat, target_feat, params,
                               common_dim, impl="auto"))
    assert jnp.allclose(out_auto, ref, atol=1e-5, rtol=1e-5)

    # 3) Faithful Pallas kernel (full Q/K/score/softmax path, validation only).
    out_faithful = jax.block_until_ready(
        cross_attention_fusion(verb_feat, inst_feat, target_feat, params,
                               common_dim, impl="pallas", faithful=True))
    assert jnp.allclose(out_faithful, ref, atol=1e-5, rtol=1e-5)

    # 4) Larger batch: exercises multi-step grid (>= 2 steps for v7x megacore).
    B2 = 64
    k2v, k2i, k2t = jax.random.split(jax.random.PRNGKey(1), 3)
    vf2 = jax.random.normal(k2v, (B2, feature_dims["verb"]), jnp.float32)
    if2 = jax.random.normal(k2i, (B2, feature_dims["instrument"]), jnp.float32)
    tf2 = jax.random.normal(k2t, (B2, feature_dims["target"]), jnp.float32)
    ref2 = _reference(vf2, if2, tf2, params, common_dim)
    out2 = jax.block_until_ready(
        cross_attention_fusion(vf2, if2, tf2, params, common_dim, impl="pallas"))
    assert jnp.allclose(out2, ref2, atol=1e-5, rtol=1e-5)

    # 5) bf16 compute + bf16 output (halves HBM bytes; f32 MXU accumulation).
    out_bf16 = jax.block_until_ready(
        cross_attention_fusion(tf2 * 0 + tf2, if2, tf2, params, common_dim,
                               impl="pallas", compute_dtype=jnp.bfloat16,
                               out_dtype=jnp.bfloat16))
    assert out_bf16.dtype == jnp.bfloat16
    assert jnp.allclose(out_bf16.astype(jnp.float32), ref2, atol=3e-2, rtol=3e-2)

    print("KERNEL_OK")
</pallas_src>

<mosaic_0001>
module attributes {stable_mosaic.version = 11 : i64} {
  func.func @_value_only_kernel(%arg0: i32, %arg1: memref<2x64xf32, #tpu.memory_space<vmem>>, %arg2: memref<64x128xf32, #tpu.memory_space<vmem>>, %arg3: memref<1x128xf32, #tpu.memory_space<vmem>>, %arg4: memref<2x128xf32, #tpu.memory_space<vmem>>) attributes {dimension_semantics = [#tpu.dimension_semantics<parallel>], iteration_bounds = array<i64: 1>, scalar_prefetch = 0 : i64, scratch_operands = 0 : i64, tpu.core_type = #tpu.core_type<tc>, window_params = [{transform_indices = @transform_0, window_bounds = array<i64: 2, 64>}, {pipeline_mode = #tpu.pipeline_mode<synchronous>, transform_indices = @transform_1, window_bounds = array<i64: 64, 128>}, {pipeline_mode = #tpu.pipeline_mode<synchronous>, transform_indices = @transform_2, window_bounds = array<i64: 1, 128>}, {transform_indices = @transform_3, window_bounds = array<i64: 2, 128>}]} {
    %c0 = arith.constant 0 : index
    %c0_0 = arith.constant 0 : index
    %0 = vector.load %arg1[%c0, %c0_0] : memref<2x64xf32, #tpu.memory_space<vmem>>, vector<2x64xf32>
    %c0_1 = arith.constant 0 : index
    %c0_2 = arith.constant 0 : index
    %1 = vector.load %arg2[%c0_1, %c0_2] : memref<64x128xf32, #tpu.memory_space<vmem>>, vector<64x128xf32>
    %cst = arith.constant dense<0.000000e+00> : vector<2x128xf32>
    %2 = tpu.matmul %0, %1, %cst {dimension_numbers = #tpu.dot_dimension_numbers<[1], [0], [0], [1], [0, 0, 1, 1], [], []>} : vector<2x64xf32>, vector<64x128xf32>, vector<2x128xf32> -> vector<2x128xf32>
    %c0_3 = arith.constant 0 : index
    %c0_4 = arith.constant 0 : index
    %3 = vector.load %arg3[%c0_3, %c0_4] : memref<1x128xf32, #tpu.memory_space<vmem>>, vector<1x128xf32>
    %4 = vector.broadcast %3 : vector<1x128xf32> to vector<2x128xf32>
    %5 = arith.addf %2, %4 : vector<2x128xf32>
    %c0_5 = arith.constant 0 : index
    %c0_6 = arith.constant 0 : index
    %6 = vector.load %arg4[%c0_5, %c0_6] : memref<2x128xf32, #tpu.memory_space<vmem>>, vector<2x128xf32>
    tpu.vector_store %arg4[%c0_5, %c0_6], %5 {strides = array<i32>} : memref<2x128xf32, #tpu.memory_space<vmem>>, vector<2x128xf32>,
    return
  }
  func.func @transform_0(%arg0: i32) -> (i32, i32) {
    %c0_i32 = arith.constant 0 : i32
    %c0_i32_0 = arith.constant 0 : i32
    return %arg0, %c0_i32 : i32, i32
  }
  func.func @transform_1(%arg0: i32) -> (i32, i32) {
    %c0_i32 = arith.constant 0 : i32
    %c0_i32_0 = arith.constant 0 : i32
    %c0_i32_1 = arith.constant 0 : i32
    return %c0_i32, %c0_i32_0 : i32, i32
  }
  func.func @transform_2(%arg0: i32) -> (i32, i32) {
    %c0_i32 = arith.constant 0 : i32
    %c0_i32_0 = arith.constant 0 : i32
    %c0_i32_1 = arith.constant 0 : i32
    return %c0_i32, %c0_i32_0 : i32, i32
  }
  func.func @transform_3(%arg0: i32) -> (i32, i32) {
    %c0_i32 = arith.constant 0 : i32
    %c0_i32_0 = arith.constant 0 : i32
    return %arg0, %c0_i32 : i32, i32
  }
}

</mosaic_0001>

<bundles_post_ra>
// kernel: tpu_custom_call.1
= control target key start
LH: loop header
LB: loop body
LE: loop exit
PB: predicated region body
PF: predicated region fallthrough
CT: control target
= control target key end

     0   :  { %8 = vsyncpa [#allocation3], 0  ;;  %s344_s0 = inlined_call_operand.hbm [shape: f32[2,64], index: 0, kind: input, shape index: {}]   ;;  %s345_s1 = inlined_call_operand.hbm [shape: f32[64,128], index: 1, kind: input, shape index: {}]   ;;  %s346_s2 = inlined_call_operand.vmem [shape: f32[1,128], index: 2, kind: input, shape index: {}]   ;;  %s347_s3 = inlined_call_operand.hbm [shape: f32[2,128], index: 3, kind: output, shape index: {}]  }
   0x1   :  { %9 = vsyncpa [#allocation6], 0 }
   0x2   :  { %10 = vsyncpa [#allocation4], 0  ;;  %s270_s12 = smov [#allocation2]   ;;  %s271_s14 = smov [#allocation5]  }
   0x3   :  { %s17_s13 = sshll.u32 %s270_s12, 4  ;;  %s26_s15 = sshll.u32 %s271_s14, 4  ;;  %s18_s13 = int_to_ptr.vmem [resolvable:$true] %s17_s13  ;;  %s298_s15 = int_to_ptr.vmem [resolvable:$true] %s26_s15 }
   0x4   :  { %s198_s18 = scalar_lea.hbm %s344_s0, 32 }
   0x5   :  { %p199_p0 = scmp.ne.s32.totalorder %s344_s0, %s198_s18  ;;  %p202_p1 = scmp.lt.u32.totalorder %s198_s18, %s344_s0 }
   0x7   :  { %p204_p2 = pnand %p202_p1, %p199_p0 }
   0x9   :  { %207 = shalt.err (!%p204_p2)
}
   0xa   :  { %s208_s23 = scalar_lea.vmem %s18_s13, 32  ;;  %p213_p4 = scmp.lt.s32.totalorder %s18_s13, %s18_s13 }
   0xb   :  { %p209_p3 = scmp.ne.s32.totalorder %s18_s13, %s208_s23  ;;  %p214_p5 = scmp.lt.s32.totalorder %s208_s23, %s208_s23 }
   0xd   :  { %p215_p6 = por %p214_p5, %p213_p4 }
   0xf   :  { %p216_p7 = pnand %p215_p6, %p209_p3 }
  0x11   :  { %219 = shalt.err (!%p216_p7)
}
  0x12   :  { %20 = dma.hbm_to_vmem [thread:$0]  %s344_s0, 32, %s18_s13, [#allocation3]  }
  0x13   :  { %s220_s28 = scalar_lea.hbm %s345_s1, 1024 }
  0x14   :  { %p221_p8 = scmp.ne.s32.totalorder %s345_s1, %s220_s28  ;;  %p224_p9 = scmp.lt.u32.totalorder %s220_s28, %s345_s1 }
  0x16   :  { %p226_p10 = pnand %p224_p9, %p221_p8 }
  0x18   :  { %229 = shalt.err (!%p226_p10)
}
  0x19   :  { %s230_s6 = scalar_lea.vmem %s298_s15, 1024  ;;  %p235_p12 = scmp.lt.s32.totalorder %s298_s15, %s298_s15 }
  0x1a   :  { %p231_p11 = scmp.ne.s32.totalorder %s298_s15, %s230_s6  ;;  %p236_p13 = scmp.lt.s32.totalorder %s230_s6, %s230_s6 }
  0x1c   :  { %p237_p0 = por %p236_p13, %p235_p12 }
  0x1e   :  { %p238_p1 = pnand %p237_p0, %p231_p11 }
  0x20   :  { %241 = shalt.err (!%p238_p1)
}
  0x21   :  { %s272_s0 = smov 128   ;;  %s273_s7 = smov 8  }
  0x22   :  { %32 = dma.hbm_to_vmem [thread:$0]  %s345_s1, 1024, %s298_s15, [#allocation6], %s272_s0, %s272_s0, %s273_s7  }
  0x23   :  { %264 = dma.done.wait [#allocation3], 32  }
  0x24   :  { %265 = vsyncadd [#allocation3], 4294967264 }
  0x25   :  { %266 = dma.done.wait [#allocation6], 1024  }
  0x26   :  { %267 = vsyncadd [#allocation6], 4294966272  ;;  %v274_v0 = vmov 0.0|0.0   ;;  %vm275_vm0 = vmmov 0   ;;  %v276_v1 = vmov 0.0   ;;  %v42_v2 = vld [vmem:[#allocation5] sm:$0xff] }
  0x27   :  { %178 = vmatprep.subr.bf16.mxu0 %v274_v0  ;;  %175 = vmatprep.mubr.msk.f32.mxu0 %vm275_vm0, %v276_v1  ;;  %v43_v3 = vld [vmem:[#allocation5 + $0x8] sm:$0xff]  ;;  %v44_v4 = vld [vmem:[#allocation5 + $0x10] sm:$0xff]  ;;  %v45_v6 = vld [vmem:[#allocation5 + $0x18] sm:$0xff]  ;;  %vm57_vm1 = vcmask 523264   ;;  %s277_s11 = smov [#allocation7]  }
  0x28   :  { %v179_v5 = vpack.c.bf16 %v43_v3, %v42_v2  ;;  %v182_v7 = vpack.c.bf16 %v45_v6, %v44_v4  ;;  %v46_v8 = vld [vmem:[#allocation5 + $0x20] sm:$0xff]  ;;  %v47_v9 = vld [vmem:[#allocation5 + $0x28] sm:$0xff]  ;;  %v48_v11 = vld [vmem:[#allocation5 + $0x30] sm:$0xff]  ;;  %s138_s12 = sshll.u32 %s277_s11, 4  ;;  %s139_s12 = int_to_ptr.vmem [resolvable:$true] %s138_s12 }
  0x29   :  { %v185_v10 = vpack.c.bf16 %v47_v9, %v46_v8  ;;  %v49_v12 = vld [vmem:[#allocation5 + $0x38] sm:$0xff]  ;;  %s242_s13 = scalar_lea.vmem %s139_s12, 32  ;;  %p247_p3 = scmp.lt.s32.totalorder %s139_s12, %s139_s12 }
  0x2a   :  { %180 = vmatpush3.bf16.msra.mxu0 %v179_v5  ;;  %v188_v13 = vpack.c.bf16 %v49_v12, %v48_v11  ;;  %v41_v14 = vld [vmem:[#allocation2] sm:$0x3]  ;;  %p243_p2 = scmp.ne.s32.totalorder %s139_s12, %s242_s13  ;;  %p248_p4 = scmp.lt.s32.totalorder %s242_s13, %s242_s13 }
  0x2b   :  { %181 = vmatprep.subr.bf16.mxu0 %v274_v0  ;;  %v148_v15 = vld [vmem:[%s346_s2] ss:$0 sm:$0xff] }
  0x2c   :  { %p249_p5 = por %p248_p4, %p247_p3 }
  0x2e   :  { %183 = vmatpush3.bf16.msra.mxu0 %v182_v7  ;;  %p250_p6 = pnand %p249_p5, %p243_p2 }
  0x2f   :  { %184 = vmatprep.subr.bf16.mxu0 %v274_v0 }
  0x32   :  { %186 = vmatpush3.bf16.msra.mxu0 %v185_v10 }
  0x33   :  { %187 = vmatprep.subr.bf16.mxu0 %v274_v0 }
  0x36   :  { %189 = vmatpush3.bf16.msra.mxu0 %v188_v13 }
  0x39   :  { %176 = vmatmul.mubr.msk.f32.vlgmr.msra.gmra.mrb[0].mxu0 %vm57_vm1, %v41_v14 }
 0x10c   :  { %v127_v16 = vpop.f32.mrb[0].mxu0 }
 0x10d   :  { %v128_v17 = vadd.f32 %v148_v15, %v127_v16  ;;  %v177_v18 = vpop.f32.mrb[1].mxu0 }
 0x10f   :  { %131 = vst [vmem:[#allocation7] sm:$0x3] %v128_v17 }
 0x110   :  { %253 = shalt.err (!%p250_p6)
}
 0x111   :  { %s254_s16 = scalar_lea.hbm %s347_s3, 32 }
 0x112   :  { %p255_p7 = scmp.ne.s32.totalorder %s347_s3, %s254_s16  ;;  %p258_p8 = scmp.lt.u32.totalorder %s254_s16, %s347_s3 }
 0x114   :  { %p260_p9 = pnand %p258_p8, %p255_p7 }
 0x116   :  { %263 = shalt.err (!%p260_p9)
}
 0x117   :  { %141 = dma.vmem_to_hbm [thread:$0]  %s139_s12, 32, %s347_s3, [#allocation4]  }
 0x118   :  { %268 = dma.done.wait [#allocation4], 32  }
 0x119   :  { %269 = vsyncadd [#allocation4], 4294967264 }
 0x11a   :  { %145 = vsyncpa [#allocation3], 1 }
 0x11b   :  { %146 = vsyncpa [#allocation6], 1 }
 0x11c   :  { %147 = vsyncpa [#allocation4], 1 }

</bundles_post_ra>
